<compile_context>
chip_gen: v5e
topology: v5e:2x2
jax: 0.10.0
libtpu: 0.0.40
codegen_flags: <defaults>
</compile_context>

<pallas_src>
import jax
import jax.numpy as jnp
from jax.experimental import pallas as pl
from jax.experimental.pallas import tpu as pltpu


def _make_kernel(have_init):
    def kernel(cam_ref, rt_ref, *rest):
        if have_init:
            init_ref, out_ref = rest
        else:
            (out_ref,) = rest

        cam = cam_ref[0]
        # Scalar reads from the packed (num_cams, 6) SMEM table: [rx ry rz tx ty tz]
        rx = rt_ref[cam, 0]
        ry = rt_ref[cam, 1]
        rz = rt_ref[cam, 2]
        tx = rt_ref[cam, 3]
        ty = rt_ref[cam, 4]
        tz = rt_ref[cam, 5]

        row = jax.lax.broadcasted_iota(jnp.int32, (4, 4), 0)
        col = jax.lax.broadcasted_iota(jnp.int32, (4, 4), 1)
        zero = jnp.zeros((4, 4), jnp.float32)

        def at(i, j, val):
            return jnp.where((row == i) & (col == j), val, zero)

        # K = skew(r), embedded in the upper-left 3x3 of a 4x4 (zeros elsewhere).
        K = (at(0, 1, -rz) + at(0, 2, ry) + at(1, 0, rz)
             + at(1, 2, -rx) + at(2, 0, -ry) + at(2, 1, rx))

        # K @ K == r r^T - |r|^2 I  (exact identity for skew-symmetric K).
        r_by_row = jnp.where(row == 0, rx,
                             jnp.where(row == 1, ry,
                                       jnp.where(row == 2, rz, 0.0)))
        r_by_col = jnp.where(col == 0, rx,
                             jnp.where(col == 1, ry,
                                       jnp.where(col == 2, rz, 0.0)))
        eye3 = jnp.where((row == col) & (row < 3), 1.0, 0.0)
        theta2 = rx * rx + ry * ry + rz * rz
        K2 = r_by_row * r_by_col - theta2 * eye3

        # Rodrigues coefficients (EUP transcendentals on one tiny vector tile).
        theta = jnp.sqrt(jnp.full((4, 4), theta2, dtype=jnp.float32)) + 1e-15
        a = jnp.sin(theta) / theta
        b = (1.0 - jnp.cos(theta)) / (theta * theta)

        R = eye3 + a * K + b * K2

        t_by_row = jnp.where(row == 0, tx,
                             jnp.where(row == 1, ty,
                                       jnp.where(row == 2, tz, 0.0)))
        t_col = jnp.where(col == 3, t_by_row, zero)
        corner = jnp.where((row == 3) & (col == 3), 1.0, 0.0)
        c2w = R + t_col + corner

        if have_init:
            init = init_ref[0]  # (4, 4) block selected by cam_id via index_map
            acc = jnp.zeros((4, 4), jnp.float32)
            for k in range(4):  # unrolled 4x4 @ 4x4 as rank-1 updates (VPU only)
                acc = acc + c2w[:, k:k + 1] * init[k:k + 1, :]
            c2w = acc

        out_ref[...] = c2w

    return kernel


def learn_pose_forward(cam_id, r, t, init_c2w=None):
    """Pallas implementation of LearnPose.forward(cam_id).

    cam_id   : int (or int32 scalar) camera index.
    r, t     : (num_cams, 3) float32 parameter arrays.
    init_c2w : optional (num_cams, 4, 4) float32 initial poses.
    Returns  : (4, 4) float32 camera-to-world matrix.
    """
    have_init = init_c2w is not None

    cam_arr = jnp.atleast_1d(jnp.asarray(cam_id, dtype=jnp.int32))
    # Pack r and t into a single small SMEM table (one SMEM operand, not two).
    rt = jnp.concatenate([r.astype(jnp.float32), t.astype(jnp.float32)], axis=1)

    in_specs = [pl.BlockSpec(memory_space=pltpu.SMEM)]
    operands = [rt]
    if have_init:
        # Only DMA the (1, 4, 4) slab of init_c2w that cam_id selects.
        in_specs.append(pl.BlockSpec((1, 4, 4), lambda i, cam: (cam[0], 0, 0)))
        operands.append(init_c2w.astype(jnp.float32))

    grid_spec = pltpu.PrefetchScalarGridSpec(
        num_scalar_prefetch=1,
        grid=(1,),
        in_specs=in_specs,
        out_specs=pl.BlockSpec((4, 4), lambda i, cam: (0, 0)),
    )

    bytes_accessed = rt.size * 4 + (64 if have_init else 0) + 64 + 4
    cost = pl.CostEstimate(flops=256, transcendentals=48,
                           bytes_accessed=bytes_accessed)

    return pl.pallas_call(
        _make_kernel(have_init),
        out_shape=jax.ShapeDtypeStruct((4, 4), jnp.float32),
        grid_spec=grid_spec,
        compiler_params=pltpu.CompilerParams(
            dimension_semantics=("arbitrary",)),
        cost_estimate=cost,
    )(cam_arr, *operands)


# ----------------------------- pure-JAX reference ---------------------------
def _vec2skew(v):
    zero = jnp.zeros((1,), jnp.float32)
    r0 = jnp.concatenate([zero, -v[2:3], v[1:2]])
    r1 = jnp.concatenate([v[2:3], zero, -v[0:1]])
    r2 = jnp.concatenate([-v[1:2], v[0:1], zero])
    return jnp.stack([r0, r1, r2], axis=0)


def _exp_so3(r):
    K = _vec2skew(r)
    theta = jnp.linalg.norm(r) + 1e-15
    eye = jnp.eye(3, dtype=jnp.float32)
    return eye + (jnp.sin(theta) / theta) * K + \
        ((1.0 - jnp.cos(theta)) / (theta * theta)) * (K @ K)


def learn_pose_reference(cam_id, r, t, init_c2w=None):
    """Pure-JAX mirror of the PyTorch LearnPose.forward."""
    rv = r[cam_id]
    tv = t[cam_id]
    R = _exp_so3(rv)
    c2w = jnp.concatenate([R, tv[:, None]], axis=1)              # (3, 4)
    bottom = jnp.array([[0.0, 0.0, 0.0, 1.0]], dtype=jnp.float32)
    c2w = jnp.concatenate([c2w, bottom], axis=0)                 # (4, 4)
    if init_c2w is not None:
        c2w = c2w @ init_c2w[cam_id]
    return c2w


if __name__ == "__main__":
    num_cams = 4
    cam_id = 2

    # Deterministic inputs. (PyTorch inits r, t to zeros; we perturb them so
    # the Rodrigues path and translation column are non-trivially exercised.)
    key = jax.random.PRNGKey(0)
    k1, k2, k3 = jax.random.split(key, 3)
    r = 0.2 * jax.random.normal(k1, (num_cams, 3), dtype=jnp.float32)
    t = jax.random.normal(k2, (num_cams, 3), dtype=jnp.float32)
    init_c2w = jnp.broadcast_to(jnp.eye(4, dtype=jnp.float32), (num_cams, 4, 4))
    pert = 0.05 * jax.random.normal(k3, (num_cams, 4, 4), dtype=jnp.float32)
    init_c2w = init_c2w + pert.at[:, 3, :].set(0.0)   # keep a valid bottom row

    # Path with init_c2w (c2w @ init_c2w[cam_id]).
    out = jax.block_until_ready(learn_pose_forward(cam_id, r, t, init_c2w))
    ref = learn_pose_reference(cam_id, r, t, init_c2w)
    assert out.shape == (4, 4) and out.dtype == jnp.float32
    assert jnp.allclose(out, ref, rtol=1e-5, atol=1e-5), (out, ref)

    # Path without init_c2w.
    out2 = jax.block_until_ready(learn_pose_forward(1, r, t))
    ref2 = learn_pose_reference(1, r, t)
    assert jnp.allclose(out2, ref2, rtol=1e-5, atol=1e-5), (out2, ref2)

    print("KERNEL_OK")
</pallas_src>

<mosaic_0001>
module attributes {stable_mosaic.version = 11 : i64} {
  func.func @kernel(%arg0: i32, %arg1: memref<1xi32, #tpu.memory_space<smem>>, %arg2: memref<4x6xf32, #tpu.memory_space<smem>>, %arg3: memref<1x4x4xf32, #tpu.memory_space<vmem>>, %arg4: memref<4x4xf32, #tpu.memory_space<vmem>>) attributes {dimension_semantics = [#tpu.dimension_semantics<arbitrary>], iteration_bounds = array<i64: 1>, scalar_prefetch = 1 : i64, scratch_operands = 0 : i64, tpu.core_type = #tpu.core_type<tc>, window_params = [{transform_indices = @transform_0, window_bounds = array<i64: 4, 6>}, {transform_indices = @transform_1, window_bounds = array<i64: 1, 4, 4>}, {pipeline_mode = #tpu.pipeline_mode<synchronous>, transform_indices = @transform_2, window_bounds = array<i64: 4, 4>}]} {
    %c0 = arith.constant 0 : index
    %0 = memref.load %arg1[%c0] : memref<1xi32, #tpu.memory_space<smem>>
    %1 = arith.index_cast %0 : i32 to index
    %c0_0 = arith.constant 0 : index
    %2 = memref.load %arg2[%1, %c0_0] : memref<4x6xf32, #tpu.memory_space<smem>>
    %3 = arith.index_cast %0 : i32 to index
    %c1 = arith.constant 1 : index
    %4 = memref.load %arg2[%3, %c1] : memref<4x6xf32, #tpu.memory_space<smem>>
    %5 = arith.index_cast %0 : i32 to index
    %c2 = arith.constant 2 : index
    %6 = memref.load %arg2[%5, %c2] : memref<4x6xf32, #tpu.memory_space<smem>>
    %7 = arith.index_cast %0 : i32 to index
    %c3 = arith.constant 3 : index
    %8 = memref.load %arg2[%7, %c3] : memref<4x6xf32, #tpu.memory_space<smem>>
    %9 = arith.index_cast %0 : i32 to index
    %c4 = arith.constant 4 : index
    %10 = memref.load %arg2[%9, %c4] : memref<4x6xf32, #tpu.memory_space<smem>>
    %11 = arith.index_cast %0 : i32 to index
    %c5 = arith.constant 5 : index
    %12 = memref.load %arg2[%11, %c5] : memref<4x6xf32, #tpu.memory_space<smem>>
    %13 = tpu.iota {dimensions = array<i32: 0>} : vector<4x4xi32>
    %14 = tpu.iota {dimensions = array<i32: 1>} : vector<4x4xi32>
    %cst = arith.constant 0.000000e+00 : f32
    %15 = vector.broadcast %cst : f32 to vector<4x4xf32>
    %cst_1 = arith.constant 0.000000e+00 : f32
    %16 = arith.subf %cst_1, %6 : f32
    %c0_i32 = arith.constant 0 : i32
    %17 = vector.broadcast %c0_i32 : i32 to vector<4x4xi32>
    %18 = arith.cmpi eq, %13, %17 : vector<4x4xi32>
    %c1_i32 = arith.constant 1 : i32
    %19 = vector.broadcast %c1_i32 : i32 to vector<4x4xi32>
    %20 = arith.cmpi eq, %14, %19 : vector<4x4xi32>
    %21 = arith.andi %18, %20 : vector<4x4xi1>
    %22 = vector.broadcast %16 : f32 to vector<4x4xf32>
    %23 = arith.select %21, %22, %15 : vector<4x4xi1>, vector<4x4xf32>
    %c0_i32_2 = arith.constant 0 : i32
    %24 = vector.broadcast %c0_i32_2 : i32 to vector<4x4xi32>
    %25 = arith.cmpi eq, %13, %24 : vector<4x4xi32>
    %c2_i32 = arith.constant 2 : i32
    %26 = vector.broadcast %c2_i32 : i32 to vector<4x4xi32>
    %27 = arith.cmpi eq, %14, %26 : vector<4x4xi32>
    %28 = arith.andi %25, %27 : vector<4x4xi1>
    %29 = vector.broadcast %4 : f32 to vector<4x4xf32>
    %30 = arith.select %28, %29, %15 : vector<4x4xi1>, vector<4x4xf32>
    %31 = arith.addf %23, %30 : vector<4x4xf32>
    %c1_i32_3 = arith.constant 1 : i32
    %32 = vector.broadcast %c1_i32_3 : i32 to vector<4x4xi32>
    %33 = arith.cmpi eq, %13, %32 : vector<4x4xi32>
    %c0_i32_4 = arith.constant 0 : i32
    %34 = vector.broadcast %c0_i32_4 : i32 to vector<4x4xi32>
    %35 = arith.cmpi eq, %14, %34 : vector<4x4xi32>
    %36 = arith.andi %33, %35 : vector<4x4xi1>
    %37 = vector.broadcast %6 : f32 to vector<4x4xf32>
    %38 = arith.select %36, %37, %15 : vector<4x4xi1>, vector<4x4xf32>
    %39 = arith.addf %31, %38 : vector<4x4xf32>
    %cst_5 = arith.constant 0.000000e+00 : f32
    %40 = arith.subf %cst_5, %2 : f32
    %c1_i32_6 = arith.constant 1 : i32
    %41 = vector.broadcast %c1_i32_6 : i32 to vector<4x4xi32>
    %42 = arith.cmpi eq, %13, %41 : vector<4x4xi32>
    %c2_i32_7 = arith.constant 2 : i32
    %43 = vector.broadcast %c2_i32_7 : i32 to vector<4x4xi32>
    %44 = arith.cmpi eq, %14, %43 : vector<4x4xi32>
    %45 = arith.andi %42, %44 : vector<4x4xi1>
    %46 = vector.broadcast %40 : f32 to vector<4x4xf32>
    %47 = arith.select %45, %46, %15 : vector<4x4xi1>, vector<4x4xf32>
    %48 = arith.addf %39, %47 : vector<4x4xf32>
    %cst_8 = arith.constant 0.000000e+00 : f32
    %49 = arith.subf %cst_8, %4 : f32
    %c2_i32_9 = arith.constant 2 : i32
    %50 = vector.broadcast %c2_i32_9 : i32 to vector<4x4xi32>
    %51 = arith.cmpi eq, %13, %50 : vector<4x4xi32>
    %c0_i32_10 = arith.constant 0 : i32
    %52 = vector.broadcast %c0_i32_10 : i32 to vector<4x4xi32>
    %53 = arith.cmpi eq, %14, %52 : vector<4x4xi32>
    %54 = arith.andi %51, %53 : vector<4x4xi1>
    %55 = vector.broadcast %49 : f32 to vector<4x4xf32>
    %56 = arith.select %54, %55, %15 : vector<4x4xi1>, vector<4x4xf32>
    %57 = arith.addf %48, %56 : vector<4x4xf32>
    %c2_i32_11 = arith.constant 2 : i32
    %58 = vector.broadcast %c2_i32_11 : i32 to vector<4x4xi32>
    %59 = arith.cmpi eq, %13, %58 : vector<4x4xi32>
    %c1_i32_12 = arith.constant 1 : i32
    %60 = vector.broadcast %c1_i32_12 : i32 to vector<4x4xi32>
    %61 = arith.cmpi eq, %14, %60 : vector<4x4xi32>
    %62 = arith.andi %59, %61 : vector<4x4xi1>
    %63 = vector.broadcast %2 : f32 to vector<4x4xf32>
    %64 = arith.select %62, %63, %15 : vector<4x4xi1>, vector<4x4xf32>
    %65 = arith.addf %57, %64 : vector<4x4xf32>
    %c0_i32_13 = arith.constant 0 : i32
    %66 = vector.broadcast %c0_i32_13 : i32 to vector<4x4xi32>
    %67 = arith.cmpi eq, %13, %66 : vector<4x4xi32>
    %c1_i32_14 = arith.constant 1 : i32
    %68 = vector.broadcast %c1_i32_14 : i32 to vector<4x4xi32>
    %69 = arith.cmpi eq, %13, %68 : vector<4x4xi32>
    %c2_i32_15 = arith.constant 2 : i32
    %70 = vector.broadcast %c2_i32_15 : i32 to vector<4x4xi32>
    %71 = arith.cmpi eq, %13, %70 : vector<4x4xi32>
    %cst_16 = arith.constant 0.000000e+00 : f32
    %72 = vector.broadcast %6 : f32 to vector<4x4xf32>
    %73 = vector.broadcast %cst_16 : f32 to vector<4x4xf32>
    %74 = arith.select %71, %72, %73 : vector<4x4xi1>, vector<4x4xf32>
    %75 = vector.broadcast %4 : f32 to vector<4x4xf32>
    %76 = arith.select %69, %75, %74 : vector<4x4xi1>, vector<4x4xf32>
    %77 = vector.broadcast %2 : f32 to vector<4x4xf32>
    %78 = arith.select %67, %77, %76 : vector<4x4xi1>, vector<4x4xf32>
    %c0_i32_17 = arith.constant 0 : i32
    %79 = vector.broadcast %c0_i32_17 : i32 to vector<4x4xi32>
    %80 = arith.cmpi eq, %14, %79 : vector<4x4xi32>
    %c1_i32_18 = arith.constant 1 : i32
    %81 = vector.broadcast %c1_i32_18 : i32 to vector<4x4xi32>
    %82 = arith.cmpi eq, %14, %81 : vector<4x4xi32>
    %c2_i32_19 = arith.constant 2 : i32
    %83 = vector.broadcast %c2_i32_19 : i32 to vector<4x4xi32>
    %84 = arith.cmpi eq, %14, %83 : vector<4x4xi32>
    %cst_20 = arith.constant 0.000000e+00 : f32
    %85 = vector.broadcast %6 : f32 to vector<4x4xf32>
    %86 = vector.broadcast %cst_20 : f32 to vector<4x4xf32>
    %87 = arith.select %84, %85, %86 : vector<4x4xi1>, vector<4x4xf32>
    %88 = vector.broadcast %4 : f32 to vector<4x4xf32>
    %89 = arith.select %82, %88, %87 : vector<4x4xi1>, vector<4x4xf32>
    %90 = vector.broadcast %2 : f32 to vector<4x4xf32>
    %91 = arith.select %80, %90, %89 : vector<4x4xi1>, vector<4x4xf32>
    %92 = arith.cmpi eq, %13, %14 : vector<4x4xi32>
    %c3_i32 = arith.constant 3 : i32
    %93 = vector.broadcast %c3_i32 : i32 to vector<4x4xi32>
    %94 = arith.cmpi slt, %13, %93 : vector<4x4xi32>
    %95 = arith.andi %92, %94 : vector<4x4xi1>
    %cst_21 = arith.constant 1.000000e+00 : f32
    %cst_22 = arith.constant 0.000000e+00 : f32
    %96 = vector.broadcast %cst_21 : f32 to vector<4x4xf32>
    %97 = vector.broadcast %cst_22 : f32 to vector<4x4xf32>
    %98 = arith.select %95, %96, %97 : vector<4x4xi1>, vector<4x4xf32>
    %99 = arith.mulf %2, %2 : f32
    %100 = arith.mulf %4, %4 : f32
    %101 = arith.addf %99, %100 : f32
    %102 = arith.mulf %6, %6 : f32
    %103 = arith.addf %101, %102 : f32
    %104 = arith.mulf %78, %91 : vector<4x4xf32>
    %105 = vector.broadcast %103 : f32 to vector<4x4xf32>
    %106 = arith.mulf %105, %98 : vector<4x4xf32>
    %107 = arith.subf %104, %106 : vector<4x4xf32>
    %108 = vector.broadcast %103 : f32 to vector<4x4xf32>
    %109 = math.sqrt %108 : vector<4x4xf32>
    %cst_23 = arith.constant 1.000000e-15 : f32
    %110 = vector.broadcast %cst_23 : f32 to vector<4x4xf32>
    %111 = arith.addf %109, %110 : vector<4x4xf32>
    %112 = math.sin %111 : vector<4x4xf32>
    %113 = arith.divf %112, %111 : vector<4x4xf32>
    %114 = math.cos %111 : vector<4x4xf32>
    %cst_24 = arith.constant 1.000000e+00 : f32
    %115 = vector.broadcast %cst_24 : f32 to vector<4x4xf32>
    %116 = arith.subf %115, %114 : vector<4x4xf32>
    %117 = arith.mulf %111, %111 : vector<4x4xf32>
    %118 = arith.divf %116, %117 : vector<4x4xf32>
    %119 = arith.mulf %113, %65 : vector<4x4xf32>
    %120 = arith.addf %98, %119 : vector<4x4xf32>
    %121 = arith.mulf %118, %107 : vector<4x4xf32>
    %122 = arith.addf %120, %121 : vector<4x4xf32>
    %c0_i32_25 = arith.constant 0 : i32
    %123 = vector.broadcast %c0_i32_25 : i32 to vector<4x4xi32>
    %124 = arith.cmpi eq, %13, %123 : vector<4x4xi32>
    %c1_i32_26 = arith.constant 1 : i32
    %125 = vector.broadcast %c1_i32_26 : i32 to vector<4x4xi32>
    %126 = arith.cmpi eq, %13, %125 : vector<4x4xi32>
    %c2_i32_27 = arith.constant 2 : i32
    %127 = vector.broadcast %c2_i32_27 : i32 to vector<4x4xi32>
    %128 = arith.cmpi eq, %13, %127 : vector<4x4xi32>
    %cst_28 = arith.constant 0.000000e+00 : f32
    %129 = vector.broadcast %12 : f32 to vector<4x4xf32>
    %130 = vector.broadcast %cst_28 : f32 to vector<4x4xf32>
    %131 = arith.select %128, %129, %130 : vector<4x4xi1>, vector<4x4xf32>
    %132 = vector.broadcast %10 : f32 to vector<4x4xf32>
    %133 = arith.select %126, %132, %131 : vector<4x4xi1>, vector<4x4xf32>
    %134 = vector.broadcast %8 : f32 to vector<4x4xf32>
    %135 = arith.select %124, %134, %133 : vector<4x4xi1>, vector<4x4xf32>
    %c3_i32_29 = arith.constant 3 : i32
    %136 = vector.broadcast %c3_i32_29 : i32 to vector<4x4xi32>
    %137 = arith.cmpi eq, %14, %136 : vector<4x4xi32>
    %138 = arith.select %137, %135, %15 : vector<4x4xi1>, vector<4x4xf32>
    %c3_i32_30 = arith.constant 3 : i32
    %139 = vector.broadcast %c3_i32_30 : i32 to vector<4x4xi32>
    %140 = arith.cmpi eq, %13, %139 : vector<4x4xi32>
    %c3_i32_31 = arith.constant 3 : i32
    %141 = vector.broadcast %c3_i32_31 : i32 to vector<4x4xi32>
    %142 = arith.cmpi eq, %14, %141 : vector<4x4xi32>
    %143 = arith.andi %140, %142 : vector<4x4xi1>
    %cst_32 = arith.constant 1.000000e+00 : f32
    %cst_33 = arith.constant 0.000000e+00 : f32
    %144 = vector.broadcast %cst_32 : f32 to vector<4x4xf32>
    %145 = vector.broadcast %cst_33 : f32 to vector<4x4xf32>
    %146 = arith.select %143, %144, %145 : vector<4x4xi1>, vector<4x4xf32>
    %147 = arith.addf %122, %138 : vector<4x4xf32>
    %148 = arith.addf %147, %146 : vector<4x4xf32>
    %c0_34 = arith.constant 0 : index
    %c0_35 = arith.constant 0 : index
    %c0_36 = arith.constant 0 : index
    %149 = vector.load %arg3[%c0_34, %c0_35, %c0_36] : memref<1x4x4xf32, #tpu.memory_space<vmem>>, vector<1x4x4xf32>
    %150 = vector.shape_cast %149 : vector<1x4x4xf32> to vector<4x4xf32>
    %cst_37 = arith.constant 0.000000e+00 : f32
    %151 = vector.broadcast %cst_37 : f32 to vector<4x4xf32>
    %152 = vector.extract_strided_slice %148 {offsets = [0, 0], sizes = [4, 1], strides = [1, 1]} : vector<4x4xf32> to vector<4x1xf32>
    %153 = vector.extract_strided_slice %150 {offsets = [0, 0], sizes = [1, 4], strides = [1, 1]} : vector<4x4xf32> to vector<1x4xf32>
    %154 = vector.broadcast %152 : vector<4x1xf32> to vector<4x4xf32>
    %155 = vector.broadcast %153 : vector<1x4xf32> to vector<4x4xf32>
    %156 = arith.mulf %154, %155 : vector<4x4xf32>
    %157 = arith.addf %151, %156 : vector<4x4xf32>
    %158 = vector.extract_strided_slice %148 {offsets = [0, 1], sizes = [4, 1], strides = [1, 1]} : vector<4x4xf32> to vector<4x1xf32>
    %159 = vector.extract_strided_slice %150 {offsets = [1, 0], sizes = [1, 4], strides = [1, 1]} : vector<4x4xf32> to vector<1x4xf32>
    %160 = vector.broadcast %158 : vector<4x1xf32> to vector<4x4xf32>
    %161 = vector.broadcast %159 : vector<1x4xf32> to vector<4x4xf32>
    %162 = arith.mulf %160, %161 : vector<4x4xf32>
    %163 = arith.addf %157, %162 : vector<4x4xf32>
    %164 = vector.extract_strided_slice %148 {offsets = [0, 2], sizes = [4, 1], strides = [1, 1]} : vector<4x4xf32> to vector<4x1xf32>
    %165 = vector.extract_strided_slice %150 {offsets = [2, 0], sizes = [1, 4], strides = [1, 1]} : vector<4x4xf32> to vector<1x4xf32>
    %166 = vector.broadcast %164 : vector<4x1xf32> to vector<4x4xf32>
    %167 = vector.broadcast %165 : vector<1x4xf32> to vector<4x4xf32>
    %168 = arith.mulf %166, %167 : vector<4x4xf32>
    %169 = arith.addf %163, %168 : vector<4x4xf32>
    %170 = vector.extract_strided_slice %148 {offsets = [0, 3], sizes = [4, 1], strides = [1, 1]} : vector<4x4xf32> to vector<4x1xf32>
    %171 = vector.extract_strided_slice %150 {offsets = [3, 0], sizes = [1, 4], strides = [1, 1]} : vector<4x4xf32> to vector<1x4xf32>
    %172 = vector.broadcast %170 : vector<4x1xf32> to vector<4x4xf32>
    %173 = vector.broadcast %171 : vector<1x4xf32> to vector<4x4xf32>
    %174 = arith.mulf %172, %173 : vector<4x4xf32>
    %175 = arith.addf %169, %174 : vector<4x4xf32>
    %c0_38 = arith.constant 0 : index
    %c0_39 = arith.constant 0 : index
    %176 = vector.load %arg4[%c0_38, %c0_39] : memref<4x4xf32, #tpu.memory_space<vmem>>, vector<4x4xf32>
    tpu.vector_store %arg4[%c0_38, %c0_39], %175 {strides = array<i32>} : memref<4x4xf32, #tpu.memory_space<vmem>>, vector<4x4xf32>,
    return
  }
  func.func @transform_0(%arg0: i32, %arg1: memref<1xi32, #tpu.memory_space<smem>>) -> (i32, i32) {
    %c0_i32 = arith.constant 0 : i32
    %c0_i32_0 = arith.constant 0 : i32
    %c0_i32_1 = arith.constant 0 : i32
    return %c0_i32, %c0_i32_0 : i32, i32
  }
  func.func @transform_1(%arg0: i32, %arg1: memref<1xi32, #tpu.memory_space<smem>>) -> (i32, i32, i32) {
    %c0 = arith.constant 0 : index
    %0 = memref.load %arg1[%c0] : memref<1xi32, #tpu.memory_space<smem>>
    %c0_i32 = arith.constant 0 : i32
    %c0_i32_0 = arith.constant 0 : i32
    %c0_i32_1 = arith.constant 0 : i32
    return %0, %c0_i32, %c0_i32_0 : i32, i32, i32
  }
  func.func @transform_2(%arg0: i32, %arg1: memref<1xi32, #tpu.memory_space<smem>>) -> (i32, i32) {
    %c0_i32 = arith.constant 0 : i32
    %c0_i32_0 = arith.constant 0 : i32
    %c0_i32_1 = arith.constant 0 : i32
    return %c0_i32, %c0_i32_0 : i32, i32
  }
}

</mosaic_0001>

<bundles_post_ra>
// kernel: tpu_custom_call.1
= control target key start
LH: loop header
LB: loop body
LE: loop exit
PB: predicated region body
PF: predicated region fallthrough
CT: control target
= control target key end

     0   :  { %9 = vsyncpa [#allocation7], 0  ;;  %s957_s0 = inlined_call_operand.<no memory space> [shape: s32[1], index: 0, kind: input, shape index: {}]   ;;  %s958_s1 = inlined_call_operand.hbm [shape: f32[4,6], index: 1, kind: input, shape index: {}]   ;;  %s959_s2 = inlined_call_operand.hbm [shape: f32[4,4,4], index: 2, kind: input, shape index: {}]   ;;  %s960_s3 = inlined_call_operand.hbm [shape: f32[4,4], index: 3, kind: output, shape index: {}]  }
   0x1   :  { %10 = vsyncpa [#allocation5], 0 }
   0x2   :  { %11 = vsyncpa [#allocation6], 0  ;;  %s17_s14 = sshll.u32 %s958_s1, 4  ;;  %s536_s17 = sshll.u32 %s957_s0, 2  ;;  %s18_s14 = int_to_ptr.hbm [resolvable:$true] %s17_s14 }
   0x3   :  { %s635_s18 = smov [#allocation4]   ;;  %s27_s21 = scalar_lea.hbm %s959_s2, %s536_s17 }
   0x4   :  { %20 = dma.hbm_to_smem %s18_s14, 64, %s635_s18, [#allocation7]  }
   0x5   :  { %s29_s22 = sshll.u32 %s27_s21, 4  ;;  %s636_s23 = smov [#allocation8]   ;;  %s30_s22 = int_to_ptr.hbm [resolvable:$true] %s29_s22 }
   0x6   :  { %s31_s24 = sshll.u32 %s636_s23, 4  ;;  %s581_s25 = sshra.s32 %s30_s22, 4  ;;  %s32_s24 = int_to_ptr.vmem [resolvable:$true] %s31_s24  ;;  %s582_s25 = int_to_ptr.hbm [resolvable:$true] %s581_s25 }
   0x7   :  { %s583_s26 = scalar_lea.hbm %s582_s25, 4  ;;  %s585_s28 = scalar_lea.hbm %s959_s2, 16 }
   0x8   :  { %p584_p0 = scmp.ne.s32.totalorder %s582_s25, %s583_s26  ;;  %p586_p1 = scmp.lt.s32.totalorder %s582_s25, %s959_s2 }
   0x9   :  { %p587_p2 = scmp.lt.s32.totalorder %s585_s28, %s583_s26 }
   0xb   :  { %p588_p3 = por %p587_p2, %p586_p1 }
   0xd   :  { %p589_p4 = pnand %p588_p3, %p584_p0 }
   0xf   :  { %592 = shalt.err (!%p589_p4)
}
  0x10   :  { %34 = dma.hbm_to_vmem [thread:$0]  %s30_s22, 64, %s32_s24, [#allocation5]  }
  0x11   :  { %629 = dma.done.wait [#allocation7], 64  }
  0x12   :  { %630 = vsyncadd [#allocation7], 4294967232 }
  0x13   :  { %631 = dma.done.wait [#allocation5], 64  }
  0x14   :  { %632 = vsyncadd [#allocation5], 4294967232 }
  0x15   :  { %43 = sfence }
  0x16   :  { %s687_s6 = sshll.u32 %s957_s0, 7  ;;  %v637_v0 = vmov 0   ;;  %v638_v24 = vmov 683565275   ;;  %v639_v26 = vmov 2475754826  }
  0x17   :  { %558 = vset.pattern.permute.xlu0 %v637_v0  ;;  %s691_s2 = sld [smem:[#allocation4 + %s687_s6]]  ;;  %s48_s7 = sadd.s32 1, %s687_s6  ;;  %v640_v28 = vmov 2131351028   ;;  %v641_v30 = vmov 2102212464  }
  0x18   :  { %s694_s8 = sld [smem:[#allocation4 + %s48_s7]]  ;;  %s50_s9 = sadd.s32 2, %s687_s6  ;;  %v642_v32 = vmov 920167782   ;;  %v643_v38 = vmov 1326507024  }
  0x19   :  { %s697_s10 = sld [smem:[#allocation4 + %s50_s9]]  ;;  %s56_s18 = sadd.s32 5, %s687_s6 }
  0x1a   :  { %s865_s19 = sld [smem:[#allocation4 + %s56_s18]]  ;;  %s54_s20 = sadd.s32 4, %s687_s6 }
  0x1b   :  { %s890_s21 = sld [smem:[#allocation4 + %s54_s20]]  ;;  %s52_s22 = sadd.s32 3, %s687_s6 }
  0x1c   :  { %s901_s23 = sld [smem:[#allocation4 + %s52_s22]]  ;;  %s648_s24 = smov [#allocation9]  }
  0x1d   :  { %s104_s0 = smul.f32 %s691_s2, %s691_s2  ;;  %s79_s16 = ssub.f32 0.0, %s691_s2 }
  0x1e   :  { %s105_s11 = smul.f32 %s694_s8, %s694_s8  ;;  %s84_s17 = ssub.f32 0.0, %s694_s8 }
  0x1f   :  { %s107_s12 = smul.f32 %s697_s10, %s697_s10  ;;  %s62_s15 = ssub.f32 0.0, %s697_s10 }
  0x20   :  { %s106_s13 = sadd.f32 %s105_s11, %s104_s0  ;;  %s521_s25 = sshll.u32 %s648_s24, 4  ;;  %s522_s25 = int_to_ptr.vmem [resolvable:$true] %s521_s25 }
  0x21   :  { %s523_s27 = sshll.u32 %s960_s3, 4  ;;  %s524_s27 = int_to_ptr.hbm [resolvable:$true] %s523_s27 }
  0x22   :  { %s108_s14 = sadd.f32 %s107_s12, %s106_s13 }
  0x24   :  { %v705_v1 = vstv %s108_s14 }
  0x25   :  { %563 = vrsqrt.f32 %v705_v1  ;;  %vm120_vm0 = vcmp.eq.f32.partialorder %v705_v1, inf  ;;  %v123_v8 = vand.u32 2147483648, %v705_v1  ;;  %vm122_vm1 = vcmp.eq.f32.partialorder %v705_v1, 0.0 }
  0x2b   :  { %v564_v2 = vpop.eup %563 }
  0x2c   :  { %v114_v3 = vmul.f32 %v564_v2, %v705_v1 }
  0x2e   :  { %v115_v4 = vmul.f32 %v564_v2, %v114_v3 }
  0x30   :  { %v116_v5 = vmul.f32 0.5, %v115_v4 }
  0x32   :  { %v117_v6 = vsub.f32 1.5, %v116_v5 }
  0x34   :  { %v118_v7 = vmul.f32 %v564_v2, %v117_v6 }
  0x36   :  { %v119_v9 = vmul.f32 %v118_v7, %v705_v1 }
  0x38   :  { %v121_v10 = vsel %vm120_vm0, %v705_v1, %v119_v9 }
  0x39   :  { %v124_v11 = vsel %vm122_vm1, %v123_v8, %v121_v10 }
  0x3a   :  { %v714_v12 = vadd.f32 1e-15, %v124_v11 }
  0x3c   :  { %v129_v13 = vand.u32 2139095040, %v714_v12  ;;  %v718_v15 = vand.u32 2147483647, %v714_v12  ;;  %565 = vrcp.f32 %v714_v12 }
  0x3e   :  { %v130_v14 = vshrl.u32 %v129_v13, 23  ;;  %v133_v18 = vand.u32 8388607, %v718_v15 }
  0x40   :  { %v538_v16 = vadd.s32 4294967169, %v130_v14  ;;  %v134_v21 = vor.u32 8388608, %v133_v18 }
  0x42   :  { %v136_v17 = vadd.s32 1, %v538_v16  ;;  %v724_v40 = vshll.u32 %v134_v21, 8 }
  0x44   :  { %vm137_vm2 = vcmp.gt.s32.totalorder %v136_v17, 0  ;;  %v175_v52 = vand.u32 65535, %v724_v40  ;;  %v176_v53 = vshrl.u32 %v724_v40, 16 }
  0x45   :  { %v138_v19 = vsel %vm137_vm2, %v136_v17, 0 }
  0x46   :  { %v140_v20 = vand.u32 31, %v138_v19  ;;  %v721_v22 = vshrl.u32 %v138_v19, 5 }
  0x48   :  { %v141_v23 = vsub.s32 32, %v140_v20  ;;  %v143_v25 = vshll.u32 %v638_v24, %v140_v20  ;;  %v146_v27 = vshll.u32 %v639_v26, %v140_v20  ;;  %v149_v29 = vshll.u32 %v640_v28, %v140_v20 }
  0x49   :  { %v152_v31 = vshll.u32 %v641_v30, %v140_v20  ;;  %v155_v33 = vshll.u32 %v642_v32, %v140_v20  ;;  %vm158_vm3 = vcmp.lt.s32.totalorder %v721_v22, 1  ;;  %vm161_vm4 = vcmp.lt.s32.totalorder %v721_v22, 4 }
  0x4a   :  { %v144_v34 = vshrl.u32 %v639_v26, %v141_v23  ;;  %v147_v35 = vshrl.u32 %v640_v28, %v141_v23  ;;  %v150_v36 = vshrl.u32 %v641_v30, %v141_v23  ;;  %v153_v37 = vshrl.u32 %v642_v32, %v141_v23 }
  0x4b   :  { %v156_v39 = vshrl.u32 %v643_v38, %v141_v23  ;;  %vm160_vm5 = vcmp.lt.s32.totalorder %v721_v22, 3  ;;  %vm159_vm6 = vcmp.lt.s32.totalorder %v721_v22, 2  ;;  %v142_v60 = vshrl.u32 %v638_v24, %v141_v23 }
  0x4c   :  { %v145_v41 = vor.u32 %v144_v34, %v143_v25  ;;  %v148_v42 = vor.u32 %v147_v35, %v146_v27  ;;  %v151_v43 = vor.u32 %v150_v36, %v149_v29  ;;  %v154_v44 = vor.u32 %v153_v37, %v152_v31 }
  0x4d   :  { %v157_v45 = vor.u32 %v156_v39, %v155_v33  ;;  %v58_v22 = vlaneseq }
  0x4e   :  { %v166_v46 = vsel %vm158_vm3, %v145_v41, %v148_v42  ;;  %v170_v47 = vsel %vm158_vm3, %v148_v42, %v151_v43  ;;  %v167_v48 = vsel %vm161_vm4, %v154_v44, 920167782  ;;  %v162_v11 = vsel %vm158_vm3, %v142_v60, %v145_v41 }
  0x4f   :  { %v171_v49 = vsel %vm161_vm4, %v157_v45, 1326507024  ;;  %v168_v50 = vsel %vm160_vm5, %v151_v43, %v167_v48  ;;  %v163_v14 = vsel %vm161_vm4, %v151_v43, 2102212464 }
  0x50   :  { %v172_v51 = vsel %vm160_vm5, %v154_v44, %v171_v49  ;;  %v169_v54 = vsel %vm159_vm6, %v166_v46, %v168_v50  ;;  %v164_v25 = vsel %vm160_vm5, %v148_v42, %v163_v14  ;;  %v760_v50 = vshrl.u32 %v58_v22, 7 }
  0x51   :  { %v173_v55 = vsel %vm159_vm6, %v170_v47, %v172_v51  ;;  %v199_v58 = vand.u32 65535, %v169_v54  ;;  %v200_v59 = vshrl.u32 %v169_v54, 16  ;;  %v165_v33 = vsel %vm159_vm6, %v162_v11, %v164_v25  ;;  %v808_v11 = vpop.eup %565 }
  0x52   :  { %v177_v56 = vand.u32 65535, %v173_v55  ;;  %v178_v57 = vshrl.u32 %v173_v55, 16  ;;  %v219_v37 = vmul.u32 %v724_v40, %v165_v33  ;;  %v762_v40 = vand.u32 127, %v58_v22 }
  0x53   :  { %v201_v2 = vmul.u32 %v199_v58, %v175_v52  ;;  %v202_v3 = vmul.u32 %v200_v59, %v175_v52  ;;  %v203_v4 = vmul.u32 %v199_v58, %v176_v53  ;;  %v204_v8 = vmul.u32 %v200_v59, %v176_v53 }
  0x54   :  { %v179_v61 = vmul.u32 %v177_v56, %v175_v52  ;;  %v180_v62 = vmul.u32 %v178_v57, %v175_v52  ;;  %v181_v63 = vmul.u32 %v177_v56, %v176_v53  ;;  %v182_v5 = vmul.u32 %v178_v57, %v176_v53 }
  0x55   :  { %v205_v9 = vshll.u32 %v202_v3, 16  ;;  %v207_v10 = vshll.u32 %v203_v4, 16  ;;  %v206_v23 = vshrl.u32 %v202_v3, 16  ;;  %v208_v29 = vshrl.u32 %v203_v4, 16 }
  0x56   :  { %v183_v6 = vshll.u32 %v180_v62, 16  ;;  %v185_v7 = vshll.u32 %v181_v63, 16  ;;  %v184_v18 = vshrl.u32 %v180_v62, 16  ;;  %v186_v26 = vshrl.u32 %v181_v63, 16 }
  0x57   :  { %vm209_vm8 = vc.u32 %v201_v2, %v205_v9  ;;  %v211_v17 = vadd.s32 %v205_v9, %v201_v2  ;;  %vm63_vm14 = vcmp.eq.s32.totalorder %v760_v50, 0  ;;  %vm64_vm15 = vcmp.eq.s32.totalorder %v762_v40, 1 }
  0x58   :  { %vm187_vm7 = vc.u32 %v179_v61, %v183_v6  ;;  %v189_v13 = vadd.s32 %v183_v6, %v179_v61  ;;  %v210_v20 = vsel %vm209_vm8, 1, %v637_v0  ;;  %vm68_vm0 = vcmp.eq.s32.totalorder %v762_v40, 2  ;;  %vm776_vm1 = vmand %vm63_vm14, %vm64_vm15 }
  0x59   :  { %v188_v16 = vsel %vm187_vm7, 1, %v637_v0  ;;  %v212_v24 = vadd.s32 %v210_v20, %v204_v8  ;;  %vm213_vm10 = vc.u32 %v211_v17, %v207_v10  ;;  %v215_v32 = vadd.s32 %v211_v17, %v207_v10  ;;  %vm784_vm2 = vmand %vm63_vm14, %vm68_vm0 }
  0x5a   :  { %v190_v19 = vadd.s32 %v188_v16, %v182_v5  ;;  %vm191_vm9 = vc.u32 %v189_v13, %v185_v7  ;;  %v214_v28 = vsel %vm213_vm10, 1, %v637_v0  ;;  %v770_v59 = vmul.f32 %v714_v12, %v714_v12 }
  0x5b   :  { %v192_v21 = vsel %vm191_vm9, 1, %v637_v0  ;;  %v216_v30 = vadd.s32 %v214_v28, %v212_v24  ;;  %v66_v61 = vstv %s62_s15  ;;  %v70_v3 = vstv %s694_s8 }
  0x5c   :  { %v194_v27 = vadd.s32 %v192_v21, %v190_v19  ;;  %vm73_vm3 = vcmp.eq.s32.totalorder %v760_v50, 1  ;;  %vm74_vm4 = vcmp.eq.s32.totalorder %v762_v40, 0  ;;  %567 = vrcp.f32 %v770_v59 }
  0x5d   :  { %v217_v34 = vadd.s32 %v216_v30, %v206_v23  ;;  %v67_v6 = vsel %vm776_vm1, %v66_v61, 0.0  ;;  %v71_v7 = vsel %vm784_vm2, %v70_v3, 0.0  ;;  %vm801_vm5 = vmand %vm73_vm3, %vm74_vm4  ;;  %v76_v10 = vstv %s697_s10 }
  0x5e   :  { %v195_v31 = vadd.s32 %v194_v27, %v184_v18  ;;  %vm128_vm6 = vcmp.lt.s32.totalorder %v714_v12, 0  ;;  %v72_v14 = vadd.f32 %v71_v7, %v67_v6  ;;  %vm127_vm7 = vcmp.le.f32.partialorder %v718_v15, 0.7853982  ;;  %vm820_vm9 = vmand %vm73_vm3, %vm68_vm0 }
  0x5f   :  { %v218_v36 = vadd.s32 %v217_v34, %v208_v29  ;;  %v77_v17 = vsel %vm801_vm5, %v76_v10, 0.0  ;;  %vm85_vm8 = vcmp.eq.s32.totalorder %v760_v50, 2  ;;  %v81_v20 = vstv %s79_s16 }
  0x60   :  { %v196_v35 = vadd.s32 %v195_v31, %v186_v26  ;;  %v97_v23 = vsel %vm68_vm0, %v76_v10, 0.0  ;;  %v282_v26 = vmul.f32 %v808_v11, %v714_v12  ;;  %v78_v27 = vadd.f32 %v77_v17, %v72_v14 }
  0x61   :  { %v222_v38 = vadd.s32 1, %v218_v36  ;;  %v94_v28 = vsel %vm85_vm8, %v76_v10, 0.0  ;;  %vm100_vm10 = vcmp.eq.s32.totalorder %v760_v50, %v762_v40  ;;  %v82_v30 = vsel %vm820_vm9, %v81_v20, 0.0 }
  0x62   :  { %vm221_vm11 = vc.u32 %v196_v35, %v215_v32  ;;  %v220_v49 = vadd.s32 %v215_v32, %v196_v35  ;;  %v814_v18 = vpop.eup %567  ;;  %v87_v33 = vstv %s84_s17  ;;  %vm287_vm1 = vweird.f32 %v808_v11 }
  0x63   :  { %v223_v39 = vsel %vm221_vm11, %v222_v38, %v218_v36  ;;  %vm101_vm11 = vcmp.lt.s32.totalorder %v760_v50, 3  ;;  %v453_v31 = vmul.f32 %v814_v18, %v770_v59  ;;  %v292_v61 = vand.u32 2147483648, %v714_v12 }
  0x64   :  { %v224_v41 = vadd.s32 %v223_v39, %v219_v37  ;;  %v644_v37 = vmov 2   ;;  %v861_v39 = vstv %s691_s2  ;;  %vm102_vm0 = vmand %vm100_vm10, %vm101_vm11  ;;  %vm457_vm5 = vweird.f32 %v770_v59 }
  0x65   :  { %560 = vset.pattern.permute.xlu1 %v644_v37  ;;  %v471_v9 = vstv %s865_s19  ;;  %v293_v10 = vor.u32 1.1754944e-38, %v292_v61  ;;  %v461_v14 = vand.u32 2147483647, %v770_v59  ;;  %vm291_vm11 = vcmp.eq.f32.partialorder %v718_v15, 8.507059e+37 }
  0x66   :  { %v225_v42 = vadd.s32 536870912, %v224_v41  ;;  %v475_v37 = vstv %s901_s23 }
  0x68   :  { %v226_v43 = vshrl.u32 %v225_v42, 30  ;;  %v283_v42 = vsub.f32 1.0, %v282_v26 }
  0x6a   :  { %v227_v44 = vshll.u32 %v226_v43, 30  ;;  %v250_v5 = vsub.s32 4, %v226_v43 }
  0x6c   :  { %v228_v0 = vsub.s32 %v224_v41, %v227_v44  ;;  %v251_v16 = vsel %vm128_vm6, %v250_v5, %v226_v43  ;;  %v95_v41 = vsel %vm73_vm3, %v70_v3, %v94_v28  ;;  %v83_v43 = vadd.f32 %v82_v30, %v78_v27 }
  0x6d   :  { %v253_v25 = vsel %vm127_vm7, 0, %v251_v16  ;;  %v98_v44 = vsel %vm64_vm15, %v70_v3, %v97_v23  ;;  %v96_v22 = vsel %vm63_vm14, %v861_v39, %v95_v41  ;;  %v463_v5 = vand.u32 2147483648, %v770_v59 }
  0x6e   :  { %vm229_vm12 = vcmp.lt.s32.totalorder %v228_v0, 0  ;;  %v230_v45 = vsub.s32 0, %v228_v0  ;;  %v270_v36 = vadd.s32 3, %v253_v25  ;;  %v472_v23 = vsel %vm85_vm8, %v471_v9, 0.0 }
  0x6f   :  { %v473_v27 = vstv %s890_s21 }
  0x70   :  { %v231_v46 = vsel %vm229_vm12, %v230_v45, %v228_v0  ;;  %vm848_vm12 = vmand %vm85_vm8, %vm74_vm4 }
  0x71   :  { %v232_v47 = vclz %v231_v46  ;;  %v88_v46 = vsel %vm848_vm12, %v87_v33, 0.0 }
  0x73   :  { %v539_v48 = vadd.s32 4294967294, %v232_v47  ;;  %v454_v47 = vsub.f32 1.0, %v453_v31 }
  0x75   :  { %vm540_vm13 = vcmp.lt.s32.totalorder %v539_v48, 0 }
  0x76   :  { %v235_v51 = vsel %vm540_vm13, 0, %v539_v48  ;;  %vm856_vm13 = vmand %vm85_vm8, %vm64_vm15  ;;  %vm269_vm15 = vweird.f32 %v714_v12  ;;  %vm477_vm8 = vcmp.eq.s32.totalorder %v762_v40, 3  ;;  %v646_v40 = vmov 1  }
  0x77   :  { %v236_v52 = vsub.s32 32, %v235_v51  ;;  %v237_v53 = vshll.u32 %v228_v0, %v235_v51  ;;  %v240_v54 = vsub.s32 4294967266, %v235_v51  ;;  %v271_v51 = vand.u32 3, %v270_v36  ;;  %vm907_vm9 = vmor %vm269_vm15, %vm287_vm1 }
  0x78   :  { %vm462_vm1 = vcmp.eq.f32.partialorder %v461_v14, 8.507059e+37 }
  0x79   :  { %v238_v55 = vshrl.u32 %v220_v49, %v236_v52  ;;  %v241_v56 = vadd.s32 127, %v240_v54  ;;  %v92_v52 = vsel %vm856_vm13, %v861_v39, 0.0  ;;  %v645_v54 = vmov 0.0  }
  0x7a   :  { %vm272_vm2 = vcmp.lt.s32.totalorder %v271_v51, 2 }
  0x7b   :  { %v239_v57 = vor.u32 %v238_v55, %v237_v53  ;;  %v242_v58 = vshll.u32 %v241_v56, 23  ;;  %v99_v53 = vsel %vm74_vm4, %v861_v39, %v98_v44  ;;  %v887_v55 = vsel %vm102_vm0, 1.0, %v645_v54 }
  0x7c   :  { %v284_v56 = vmul.f32 %v808_v11, %v283_v42  ;;  %vm273_vm4 = vcmp.eq.s32.totalorder %v271_v51, 0  ;;  %v109_v59 = vmul.f32 %v99_v53, %v96_v22  ;;  %v111_v28 = vmul.f32 %v705_v1, %v887_v55 }
  0x7d   :  { %v243_v62 = vor.u32 4788187, %v242_v58  ;;  %v246_v63 = vcvt.s32.f32 %v239_v57  ;;  %v89_v57 = vadd.f32 %v88_v46, %v83_v43 }
  0x7e   :  { %v112_v38 = vsub.f32 %v109_v59, %v111_v28 }
  0x7f   :  { %v244_v4 = vand.u32 2147483647, %v243_v62  ;;  %v440_v62 = vand.u32 3, %v253_v25  ;;  %v93_v32 = vadd.f32 %v92_v52, %v89_v57 }
  0x81   :  { %v247_v8 = vmul.f32 %v246_v63, %v244_v4  ;;  %v455_v63 = vmul.f32 %v814_v18, %v454_v47  ;;  %v285_v4 = vadd.f32 %v808_v11, %v284_v56  ;;  %vm445_vm10 = vcmp.eq.s32.totalorder %v440_v62, 2 }
  0x82   :  { %vm441_vm12 = vcmp.lt.s32.totalorder %v440_v62, 2  ;;  %vm442_vm0 = vcmp.eq.s32.totalorder %v440_v62, 0 }
  0x83   :  { %v248_v13 = vxor.u32 2147483648, %v247_v8  ;;  %v289_v20 = vsel %vm907_vm9, %v808_v11, %v285_v4 }
  0x84   :  { %v294_v30 = vsel %vm291_vm11, %v293_v10, %v289_v20 }
  0x85   :  { %v249_v21 = vsel %vm128_vm6, %v248_v13, %v247_v8  ;;  %vm458_vm6 = vweird.f32 %v814_v18  ;;  %v456_v13 = vadd.f32 %v814_v18, %v455_v63 }
  0x86   :  { %v828_v24 = vsel %vm127_vm7, %v714_v12, %v249_v21  ;;  %vm276_vm7 = vcmp.eq.s32.totalorder %v271_v51, 2  ;;  %vm920_vm13 = vmor %vm457_vm5, %vm458_vm6  ;;  %v464_v21 = vor.u32 1.1754944e-38, %v463_v5  ;;  %v484_v51 = vld [vmem:[#allocation8] sm:$0xf] }
  0x87   :  { %v254_v29 = vmul.f32 %v828_v24, %v828_v24  ;;  %v490_v52 = vperm.slane %v484_v51, 0  ;;  %v497_v53 = vperm.slane %v484_v51, 1  ;;  %v511_v56 = vperm.slane %v484_v51, 3 }
  0x89   :  { %v255_v34 = vmul.f32 -0.001358992, %v254_v29  ;;  %v262_v35 = vmul.f32 -0.00019511016, %v254_v29 }
  0x8b   :  { %v256_v0 = vadd.f32 0.041655596, %v255_v34  ;;  %v263_v45 = vadd.f32 0.008332121, %v262_v35  ;;  %v474_v35 = vsel %vm73_vm3, %v473_v27, %v472_v23 }
  0x8c   :  { %v476_v43 = vsel %vm63_vm14, %v475_v37, %v474_v35  ;;  %vm514_vm14 = vcmask 27648  }
  0x8d   :  { %v257_v48 = vmul.f32 %v256_v0, %v254_v29  ;;  %v264_v49 = vmul.f32 %v263_v45, %v254_v29  ;;  %v478_v12 = vsel %vm477_vm8, %v476_v43, 0.0 }
  0x8f   :  { %v258_v58 = vadd.f32 -0.4999988, %v257_v48  ;;  %v265_v60 = vadd.f32 -0.16666654, %v264_v49  ;;  %v647_v48 = vmov 3  }
  0x91   :  { %v259_v2 = vmul.f32 %v258_v58, %v254_v29  ;;  %v266_v3 = vmul.f32 %v265_v60, %v254_v29  ;;  %v460_v29 = vsel %vm920_vm13, %v814_v18, %v456_v13 }
  0x92   :  { %v465_v36 = vsel %vm462_vm1, %v464_v21, %v460_v29 }
  0x93   :  { %v260_v6 = vadd.f32 1.0, %v259_v2  ;;  %v267_v7 = vadd.f32 1.0, %v266_v3 }
  0x95   :  { %v268_v16 = vmul.f32 %v267_v7, %v828_v24  ;;  %v277_v17 = vxor.u32 2147483648, %v260_v6 }
  0x97   :  { %v274_v24 = vxor.u32 2147483648, %v268_v16  ;;  %v278_v25 = vsel %vm276_vm7, %v277_v17, %v268_v16  ;;  %v447_v26 = vsel %vm445_vm10, %v277_v17, %v268_v16 }
  0x99   :  { %v275_v11 = vsel %vm273_vm4, %v260_v6, %v274_v24  ;;  %v444_v31 = vsel %vm442_vm0, %v260_v6, %v274_v24 }
  0x9a   :  { %v279_v33 = vsel %vm272_vm2, %v275_v11, %v278_v25  ;;  %v448_v34 = vsel %vm441_vm12, %v444_v31, %v447_v26  ;;  %vm479_vm2 = vcmp.eq.s32.totalorder %v760_v50, 3 }
  0x9b   :  { %v280_v1 = vsel %vm269_vm15, nan, %v279_v33  ;;  %v449_v18 = vsel %vm269_vm15, nan, %v448_v34  ;;  %vm480_vm3 = vmand %vm479_vm2, %vm477_vm8 }
  0x9c   :  { %v295_v15 = vmul.f32 %v294_v30, %v280_v1  ;;  %v450_v39 = vsub.f32 1.0, %v449_v18  ;;  %v481_v46 = vsel %vm480_vm3, 1.0, %v645_v54 }
  0x9e   :  { %v466_v41 = vmul.f32 %v465_v36, %v450_v39  ;;  %v467_v42 = vmul.f32 %v295_v15, %v93_v32 }
  0xa0   :  { %v468_v44 = vadd.f32 %v467_v42, %v887_v55  ;;  %v469_v0 = vmul.f32 %v466_v41, %v112_v38  ;;  %v504_v55 = vperm.slane %v484_v51, 2 }
  0xa2   :  { %v470_v45 = vadd.f32 %v469_v0, %v468_v44 }
  0xa4   :  { %v482_v47 = vadd.f32 %v478_v12, %v470_v45 }
  0xa6   :  { %v483_v22 = vadd.f32 %v482_v47, %v481_v46 }
  0xa8   :  { %487 = vperm.xlu0 %558, %v483_v22   ;;  %501 = vperm.xlu1 %560, %v483_v22  }
  0xb0   :  { %559 = vset.pattern.permute.xlu0 %v646_v40  ;;  %561 = vset.pattern.permute.xlu1 %v647_v48 }
  0xb1   :  { %494 = vperm.xlu0 %559, %v483_v22   ;;  %508 = vperm.xlu1 %561, %v483_v22  }
  0xb9   :  { %562 = vset.pattern.permute.xlu0 %v647_v48 }
 0x11a   :  { %v488_v50 = vpop.permute.xlu0 %487  ;;  %v502_v49 = vpop.permute.xlu1 %501 }
 0x11b   :  { %v491_v58 = vmul.f32 %v490_v52, %v488_v50  ;;  %v505_v61 = vmul.f32 %v504_v55, %v502_v49 }
 0x123   :  { %v495_v57 = vpop.permute.xlu0 %494  ;;  %v509_v54 = vpop.permute.xlu1 %508 }
 0x124   :  { %v498_v60 = vmul.f32 %v497_v53, %v495_v57  ;;  %v512_v63 = vmul.f32 %v511_v56, %v509_v54 }
 0x126   :  { %v499_v62 = vadd.f32 %v498_v60, %v491_v58 }
 0x128   :  { %v506_v2 = vadd.f32 %v505_v61, %v499_v62 }
 0x12a   :  { %v513_v3 = vadd.f32 %v512_v63, %v506_v2 }
 0x12c   :  { %515 = vst.msk [vmem:[#allocation9] sm:$0xf] %vm514_vm14, %v513_v3 }
 0x12d   :  { %526 = dma.vmem_to_hbm [thread:$0]  %s522_s25, 64, %s524_s27, [#allocation6]  }
 0x12e   :  { %633 = dma.done.wait [#allocation6], 64  }
 0x12f   :  { %634 = vsyncadd [#allocation6], 4294967232 }
 0x130   :  { %531 = vsyncpa [#allocation5], 1 }
 0x131   :  { %532 = vsyncpa [#allocation6], 1 }
 0x132   :  { %533 = vsyncpa [#allocation7], 1 }

</bundles_post_ra>
